<compile_context>
chip_gen: v5e
topology: v5e:2x2
jax: 0.10.0
libtpu: 0.0.40
codegen_flags: <defaults>
</compile_context>

<pallas_src>
import math

import jax
import jax.numpy as jnp
import numpy as np
from jax.experimental import pallas as pl
from jax.experimental.pallas import tpu as pltpu


def make_self_attention_kernel(H: int, scale: float):
    """Fused self-attention kernel over one batch-tile of Nb = bb*T rows."""

    def kernel(x_ref, mask_ref, wq_ref, bq_ref, wkT_ref, bk_ref, wv_ref, bv_ref,
               wp_ref, bp_ref, o_ref):
        x = x_ref[...]                                # (Nb, C) f32
        x_bf = x.astype(jnp.bfloat16)                 # bf16 operand for q/v matmuls
        xT_bf = x.T.astype(jnp.bfloat16)              # (C, Nb); ONE transpose shared by all heads' K
        mask = mask_ref[...]                          # (Nb, Nb) additive mask: 0 / -1e30 (f32)

        acc = bp_ref[...]                             # (1, C) f32; broadcasts on first add

        for h in range(H):                            # H is a small static constant -> unrolled
            # Per-head projections: bf16 inputs, f32 accumulation, f32 bias add.
            q = jnp.dot(x_bf, wq_ref[h], preferred_element_type=jnp.float32) + bq_ref[h]   # (Nb, D)
            q = q * scale                                                                   # fold 1/sqrt(D) into q
            kT = jnp.dot(wkT_ref[h], xT_bf, preferred_element_type=jnp.float32) + bk_ref[h]  # (D, Nb)
            v = jnp.dot(x_bf, wv_ref[h], preferred_element_type=jnp.float32) + bv_ref[h]   # (Nb, D)

            # Scores: q @ k^T with K already in (D, Nb) layout -> no per-head transpose.
            s = jnp.dot(q.astype(jnp.bfloat16), kT.astype(jnp.bfloat16),
                        preferred_element_type=jnp.float32)                                # (Nb, Nb) f32
            s = s + mask                                                                    # batch-block (+ causal) mask

            # Numerically-stable softmax, f32; reciprocal on the EUP slot.
            s = s - jnp.max(s, axis=-1, keepdims=True)
            p = jnp.exp(s)
            p = p * pl.reciprocal(jnp.sum(p, axis=-1, keepdims=True), approx=True)

            # y_h = p @ v, then accumulate this head's slice of c_proj directly into the
            # (Nb, C) output: out = bias + sum_h y_h @ Wp[h*D:(h+1)*D, :]  (no concat).
            y_h = jnp.dot(p.astype(jnp.bfloat16), v.astype(jnp.bfloat16),
                          preferred_element_type=jnp.float32)                              # (Nb, D)
            acc = acc + jnp.dot(y_h.astype(jnp.bfloat16), wp_ref[h],
                                preferred_element_type=jnp.float32)                        # (Nb, C)

        o_ref[...] = acc.astype(o_ref.dtype)

    return kernel


def self_attention_pallas(x, wqkv, bqkv, wproj, bproj, *, n_heads: int,
                          masked: bool = False, batch_block: int | None = None):
    B, T, C = x.shape
    H = n_heads
    assert C % H == 0
    D = C // H
    scale = 1.0 / math.sqrt(D)

    bb = B if batch_block is None else batch_block   # batch elements per grid step
    assert B % bb == 0
    Nb = bb * T                                      # rows per grid step

    # ---- host/wrapper-side layout plumbing (tiny, one-time per call) ----
    bf = jnp.bfloat16
    wq, wk, wv = jnp.split(wqkv, 3, axis=1)                         # each (C, C)
    bq, bk, bv = jnp.split(bqkv.reshape(-1), 3)                     # each (C,)
    wq3 = wq.reshape(C, H, D).transpose(1, 0, 2).astype(bf)         # (H, C, D)
    wkT3 = wk.reshape(C, H, D).transpose(1, 2, 0).astype(bf)        # (H, D, C)  K pre-transposed
    wv3 = wv.reshape(C, H, D).transpose(1, 0, 2).astype(bf)         # (H, C, D)
    wp3 = wproj.reshape(H, D, C).astype(bf)                         # (H, D, C)  proj split per head
    bq3 = bq.reshape(H, 1, D).astype(jnp.float32)
    bk3 = bk.reshape(H, D, 1).astype(jnp.float32)
    bv3 = bv.reshape(H, 1, D).astype(jnp.float32)
    bp2 = bproj.reshape(1, C).astype(jnp.float32)

    # Static additive mask: rows may only attend within their own batch element
    # (needed because bb batch elements are flattened into Nb rows), plus causal.
    r = np.arange(Nb)
    valid = (r[:, None] // T) == (r[None, :] // T)
    if masked:
        valid = valid & (r[None, :] <= r[:, None])
    mask_add = jnp.asarray(np.where(valid, 0.0, -1e30).astype(np.float32))   # (Nb, Nb)

    x2 = x.reshape(B * T, C)

    kernel = make_self_attention_kernel(H, scale)
    out2 = pl.pallas_call(
        kernel,
        out_shape=jax.ShapeDtypeStruct((B * T, C), x.dtype),
        grid=(B // bb,),
        in_specs=[
            pl.BlockSpec((Nb, C), lambda i: (i, 0)),        # x rows for this batch tile
            pl.BlockSpec((Nb, Nb), lambda i: (0, 0)),       # additive mask (static)
            pl.BlockSpec((H, C, D), lambda i: (0, 0, 0)),   # Wq  (bf16)
            pl.BlockSpec((H, 1, D), lambda i: (0, 0, 0)),   # bq
            pl.BlockSpec((H, D, C), lambda i: (0, 0, 0)),   # Wk^T (bf16)
            pl.BlockSpec((H, D, 1), lambda i: (0, 0, 0)),   # bk
            pl.BlockSpec((H, C, D), lambda i: (0, 0, 0)),   # Wv  (bf16)
            pl.BlockSpec((H, 1, D), lambda i: (0, 0, 0)),   # bv
            pl.BlockSpec((H, D, C), lambda i: (0, 0, 0)),   # Wproj (bf16, per-head slices)
            pl.BlockSpec((1, C), lambda i: (0, 0)),         # bproj
        ],
        out_specs=pl.BlockSpec((Nb, C), lambda i: (i, 0)),
        compiler_params=pltpu.CompilerParams(dimension_semantics=("parallel",)),
    )(x2, mask_add, wq3, bq3, wkT3, bk3, wv3, bv3, wp3, bp2)

    return out2.reshape(B, T, C)


def self_attention_ref(x, wqkv, bqkv, wproj, bproj, *, n_heads: int, masked: bool = False):
    """Pure-JAX reference mirroring the PyTorch forward (eval mode).

    Matmul inputs are rounded to bf16 with f32 accumulation to mirror the kernel's
    deliberate mixed-precision MXU usage, so the comparison tolerance stays meaningful.
    """
    B, T, C = x.shape
    H = n_heads
    D = C // H
    scale = 1.0 / math.sqrt(D)
    bf, f32 = jnp.bfloat16, jnp.float32

    qkv = jnp.dot(x.reshape(B * T, C).astype(bf), wqkv.astype(bf),
                  preferred_element_type=f32) + bqkv.reshape(1, 3 * C)
    q, k, v = jnp.split(qkv, 3, axis=-1)
    q = q.reshape(B, T, H, D).transpose(0, 2, 1, 3) * scale
    k = k.reshape(B, T, H, D).transpose(0, 2, 1, 3)
    v = v.reshape(B, T, H, D).transpose(0, 2, 1, 3)
    att = jnp.einsum("bhtd,bhsd->bhts", q.astype(bf), k.astype(bf),
                     preferred_element_type=f32)
    if masked:
        causal = jnp.tril(jnp.ones((T, T), dtype=bool))
        att = jnp.where(causal[None, None], att, -jnp.inf)
    att = jax.nn.softmax(att, axis=-1)
    y = jnp.einsum("bhts,bhsd->bhtd", att.astype(bf), v.astype(bf),
                   preferred_element_type=f32)
    y = y.transpose(0, 2, 1, 3).reshape(B * T, C)
    out = jnp.dot(y.astype(bf), wproj.astype(bf),
                  preferred_element_type=f32) + bproj.reshape(1, C)
    return out.reshape(B, T, C)


if __name__ == "__main__":
    # config: n_embd=32, n_heads=4, tags_maxlen>=T, bias=True, dropout=0 (eval)
    B, T, C, H = 2, 8, 32, 4
    key = jax.random.PRNGKey(0)
    k_x, k_w1, k_b1, k_w2, k_b2 = jax.random.split(key, 5)

    x = jax.random.normal(k_x, (B, T, C), dtype=jnp.float32)
    # Deterministic parameter init (c_attn: C -> 3C, c_proj: C -> C), stored as [in, out].
    wqkv = jax.random.normal(k_w1, (C, 3 * C), dtype=jnp.float32) * (1.0 / math.sqrt(C))
    bqkv = jax.random.normal(k_b1, (1, 3 * C), dtype=jnp.float32) * 0.02
    wproj = jax.random.normal(k_w2, (C, C), dtype=jnp.float32) * (1.0 / math.sqrt(C))
    bproj = jax.random.normal(k_b2, (1, C), dtype=jnp.float32) * 0.02

    for masked in (False, True):
        out = self_attention_pallas(x, wqkv, bqkv, wproj, bproj, n_heads=H, masked=masked)
        out = jax.block_until_ready(out)
        ref = self_attention_ref(x, wqkv, bqkv, wproj, bproj, n_heads=H, masked=masked)
        # Tolerance covers the deliberate bf16 MXU inputs + approx EUP reciprocal; a
        # structural bug (mask / head mapping / bias) would exceed this by orders of magnitude.
        np.testing.assert_allclose(np.asarray(out), np.asarray(ref), rtol=3e-2, atol=3e-2)

    print("KERNEL_OK")
</pallas_src>

<mosaic_0001>
module attributes {stable_mosaic.version = 11 : i64} {
  func.func @kernel(%arg0: i32, %arg1: memref<16x32xf32, #tpu.memory_space<vmem>>, %arg2: memref<16x16xf32, #tpu.memory_space<vmem>>, %arg3: memref<4x32x8xbf16, #tpu.memory_space<vmem>>, %arg4: memref<4x1x8xf32, #tpu.memory_space<vmem>>, %arg5: memref<4x8x32xbf16, #tpu.memory_space<vmem>>, %arg6: memref<4x8x1xf32, #tpu.memory_space<vmem>>, %arg7: memref<4x32x8xbf16, #tpu.memory_space<vmem>>, %arg8: memref<4x1x8xf32, #tpu.memory_space<vmem>>, %arg9: memref<4x8x32xbf16, #tpu.memory_space<vmem>>, %arg10: memref<1x32xf32, #tpu.memory_space<vmem>>, %arg11: memref<16x32xf32, #tpu.memory_space<vmem>>) attributes {dimension_semantics = [#tpu.dimension_semantics<parallel>], iteration_bounds = array<i64: 1>, scalar_prefetch = 0 : i64, scratch_operands = 0 : i64, tpu.core_type = #tpu.core_type<tc>, window_params = [{transform_indices = @transform_0, window_bounds = array<i64: 16, 32>}, {pipeline_mode = #tpu.pipeline_mode<synchronous>, transform_indices = @transform_1, window_bounds = array<i64: 16, 16>}, {pipeline_mode = #tpu.pipeline_mode<synchronous>, transform_indices = @transform_2, window_bounds = array<i64: 4, 32, 8>}, {pipeline_mode = #tpu.pipeline_mode<synchronous>, transform_indices = @transform_3, window_bounds = array<i64: 4, 1, 8>}, {pipeline_mode = #tpu.pipeline_mode<synchronous>, transform_indices = @transform_4, window_bounds = array<i64: 4, 8, 32>}, {pipeline_mode = #tpu.pipeline_mode<synchronous>, transform_indices = @transform_5, window_bounds = array<i64: 4, 8, 1>}, {pipeline_mode = #tpu.pipeline_mode<synchronous>, transform_indices = @transform_6, window_bounds = array<i64: 4, 32, 8>}, {pipeline_mode = #tpu.pipeline_mode<synchronous>, transform_indices = @transform_7, window_bounds = array<i64: 4, 1, 8>}, {pipeline_mode = #tpu.pipeline_mode<synchronous>, transform_indices = @transform_8, window_bounds = array<i64: 4, 8, 32>}, {pipeline_mode = #tpu.pipeline_mode<synchronous>, transform_indices = @transform_9, window_bounds = array<i64: 1, 32>}, {transform_indices = @transform_10, window_bounds = array<i64: 16, 32>}]} {
    %c0 = arith.constant 0 : index
    %c0_0 = arith.constant 0 : index
    %0 = vector.load %arg1[%c0, %c0_0] : memref<16x32xf32, #tpu.memory_space<vmem>>, vector<16x32xf32>
    %1 = arith.truncf %0 : vector<16x32xf32> to vector<16x32xbf16>
    %2 = tpu.transpose %0, [1, 0] : vector<16x32xf32> -> vector<32x16xf32>
    %3 = arith.truncf %2 : vector<32x16xf32> to vector<32x16xbf16>
    %c0_1 = arith.constant 0 : index
    %c0_2 = arith.constant 0 : index
    %4 = vector.load %arg2[%c0_1, %c0_2] : memref<16x16xf32, #tpu.memory_space<vmem>>, vector<16x16xf32>
    %c0_3 = arith.constant 0 : index
    %c0_4 = arith.constant 0 : index
    %5 = vector.load %arg10[%c0_3, %c0_4] : memref<1x32xf32, #tpu.memory_space<vmem>>, vector<1x32xf32>
    %c0_5 = arith.constant 0 : index
    %c0_6 = arith.constant 0 : index
    %c0_7 = arith.constant 0 : index
    %6 = vector.load %arg3[%c0_5, %c0_6, %c0_7] : memref<4x32x8xbf16, #tpu.memory_space<vmem>>, vector<1x32x8xbf16>
    %7 = vector.shape_cast %6 : vector<1x32x8xbf16> to vector<32x8xbf16>
    %cst = arith.constant dense<0.000000e+00> : vector<16x8xf32>
    %8 = tpu.matmul %1, %7, %cst {dimension_numbers = #tpu.dot_dimension_numbers<[1], [0], [0], [1], [0, 0, 1, 1], [], []>} : vector<16x32xbf16>, vector<32x8xbf16>, vector<16x8xf32> -> vector<16x8xf32>
    %c0_8 = arith.constant 0 : index
    %c0_9 = arith.constant 0 : index
    %c0_10 = arith.constant 0 : index
    %9 = vector.load %arg4[%c0_8, %c0_9, %c0_10] : memref<4x1x8xf32, #tpu.memory_space<vmem>>, vector<1x1x8xf32>
    %10 = vector.shape_cast %9 : vector<1x1x8xf32> to vector<1x8xf32>
    %11 = vector.broadcast %10 : vector<1x8xf32> to vector<16x8xf32>
    %12 = arith.addf %8, %11 : vector<16x8xf32>
    %cst_11 = arith.constant 0.353553385 : f32
    %13 = vector.broadcast %cst_11 : f32 to vector<16x8xf32>
    %14 = arith.mulf %12, %13 : vector<16x8xf32>
    %c0_12 = arith.constant 0 : index
    %c0_13 = arith.constant 0 : index
    %c0_14 = arith.constant 0 : index
    %15 = vector.load %arg5[%c0_12, %c0_13, %c0_14] : memref<4x8x32xbf16, #tpu.memory_space<vmem>>, vector<1x8x32xbf16>
    %16 = vector.shape_cast %15 : vector<1x8x32xbf16> to vector<8x32xbf16>
    %cst_15 = arith.constant dense<0.000000e+00> : vector<8x16xf32>
    %17 = tpu.matmul %16, %3, %cst_15 {dimension_numbers = #tpu.dot_dimension_numbers<[1], [0], [0], [1], [0, 0, 1, 1], [], []>} : vector<8x32xbf16>, vector<32x16xbf16>, vector<8x16xf32> -> vector<8x16xf32>
    %c0_16 = arith.constant 0 : index
    %c0_17 = arith.constant 0 : index
    %c0_18 = arith.constant 0 : index
    %18 = vector.load %arg6[%c0_16, %c0_17, %c0_18] : memref<4x8x1xf32, #tpu.memory_space<vmem>>, vector<1x8x1xf32>
    %19 = vector.shape_cast %18 : vector<1x8x1xf32> to vector<8x1xf32>
    %20 = vector.broadcast %19 : vector<8x1xf32> to vector<8x16xf32>
    %21 = arith.addf %17, %20 : vector<8x16xf32>
    %c0_19 = arith.constant 0 : index
    %c0_20 = arith.constant 0 : index
    %c0_21 = arith.constant 0 : index
    %22 = vector.load %arg7[%c0_19, %c0_20, %c0_21] : memref<4x32x8xbf16, #tpu.memory_space<vmem>>, vector<1x32x8xbf16>
    %23 = vector.shape_cast %22 : vector<1x32x8xbf16> to vector<32x8xbf16>
    %cst_22 = arith.constant dense<0.000000e+00> : vector<16x8xf32>
    %24 = tpu.matmul %1, %23, %cst_22 {dimension_numbers = #tpu.dot_dimension_numbers<[1], [0], [0], [1], [0, 0, 1, 1], [], []>} : vector<16x32xbf16>, vector<32x8xbf16>, vector<16x8xf32> -> vector<16x8xf32>
    %c0_23 = arith.constant 0 : index
    %c0_24 = arith.constant 0 : index
    %c0_25 = arith.constant 0 : index
    %25 = vector.load %arg8[%c0_23, %c0_24, %c0_25] : memref<4x1x8xf32, #tpu.memory_space<vmem>>, vector<1x1x8xf32>
    %26 = vector.shape_cast %25 : vector<1x1x8xf32> to vector<1x8xf32>
    %27 = vector.broadcast %26 : vector<1x8xf32> to vector<16x8xf32>
    %28 = arith.addf %24, %27 : vector<16x8xf32>
    %29 = arith.truncf %14 : vector<16x8xf32> to vector<16x8xbf16>
    %30 = arith.truncf %21 : vector<8x16xf32> to vector<8x16xbf16>
    %cst_26 = arith.constant dense<0.000000e+00> : vector<16x16xf32>
    %31 = tpu.matmul %29, %30, %cst_26 {dimension_numbers = #tpu.dot_dimension_numbers<[1], [0], [0], [1], [0, 0, 1, 1], [], []>} : vector<16x8xbf16>, vector<8x16xbf16>, vector<16x16xf32> -> vector<16x16xf32>
    %32 = arith.addf %31, %4 : vector<16x16xf32>
    %cst_27 = arith.constant dense<0xFF800000> : vector<16xf32>
    %33 = vector.multi_reduction <maximumf>, %32, %cst_27 [1] : vector<16x16xf32> to vector<16xf32>
    %34 = vector.shape_cast %33 : vector<16xf32> to vector<16x1xf32>
    %35 = vector.broadcast %34 : vector<16x1xf32> to vector<16x16xf32>
    %36 = arith.subf %32, %35 : vector<16x16xf32>
    %37 = math.exp %36 : vector<16x16xf32>
    %cst_28 = arith.constant dense<0.000000e+00> : vector<16xf32>
    %38 = vector.multi_reduction <add>, %37, %cst_28 [1] : vector<16x16xf32> to vector<16xf32>
    %39 = vector.shape_cast %38 : vector<16xf32> to vector<16x1xf32>
    %40 = tpu.reciprocal %39 {approx = true} : vector<16x1xf32> -> vector<16x1xf32>
    %41 = vector.broadcast %40 : vector<16x1xf32> to vector<16x16xf32>
    %42 = arith.mulf %37, %41 : vector<16x16xf32>
    %43 = arith.truncf %42 : vector<16x16xf32> to vector<16x16xbf16>
    %44 = arith.truncf %28 : vector<16x8xf32> to vector<16x8xbf16>
    %cst_29 = arith.constant dense<0.000000e+00> : vector<16x8xf32>
    %45 = tpu.matmul %43, %44, %cst_29 {dimension_numbers = #tpu.dot_dimension_numbers<[1], [0], [0], [1], [0, 0, 1, 1], [], []>} : vector<16x16xbf16>, vector<16x8xbf16>, vector<16x8xf32> -> vector<16x8xf32>
    %46 = arith.truncf %45 : vector<16x8xf32> to vector<16x8xbf16>
    %c0_30 = arith.constant 0 : index
    %c0_31 = arith.constant 0 : index
    %c0_32 = arith.constant 0 : index
    %47 = vector.load %arg9[%c0_30, %c0_31, %c0_32] : memref<4x8x32xbf16, #tpu.memory_space<vmem>>, vector<1x8x32xbf16>
    %48 = vector.shape_cast %47 : vector<1x8x32xbf16> to vector<8x32xbf16>
    %cst_33 = arith.constant dense<0.000000e+00> : vector<16x32xf32>
    %49 = tpu.matmul %46, %48, %cst_33 {dimension_numbers = #tpu.dot_dimension_numbers<[1], [0], [0], [1], [0, 0, 1, 1], [], []>} : vector<16x8xbf16>, vector<8x32xbf16>, vector<16x32xf32> -> vector<16x32xf32>
    %50 = vector.broadcast %5 : vector<1x32xf32> to vector<16x32xf32>
    %51 = arith.addf %50, %49 : vector<16x32xf32>
    %c1 = arith.constant 1 : index
    %c0_34 = arith.constant 0 : index
    %c0_35 = arith.constant 0 : index
    %52 = vector.load %arg3[%c1, %c0_34, %c0_35] : memref<4x32x8xbf16, #tpu.memory_space<vmem>>, vector<1x32x8xbf16>
    %53 = vector.shape_cast %52 : vector<1x32x8xbf16> to vector<32x8xbf16>
    %cst_36 = arith.constant dense<0.000000e+00> : vector<16x8xf32>
    %54 = tpu.matmul %1, %53, %cst_36 {dimension_numbers = #tpu.dot_dimension_numbers<[1], [0], [0], [1], [0, 0, 1, 1], [], []>} : vector<16x32xbf16>, vector<32x8xbf16>, vector<16x8xf32> -> vector<16x8xf32>
    %c1_37 = arith.constant 1 : index
    %c0_38 = arith.constant 0 : index
    %c0_39 = arith.constant 0 : index
    %55 = vector.load %arg4[%c1_37, %c0_38, %c0_39] : memref<4x1x8xf32, #tpu.memory_space<vmem>>, vector<1x1x8xf32>
    %56 = vector.shape_cast %55 : vector<1x1x8xf32> to vector<1x8xf32>
    %57 = vector.broadcast %56 : vector<1x8xf32> to vector<16x8xf32>
    %58 = arith.addf %54, %57 : vector<16x8xf32>
    %cst_40 = arith.constant 0.353553385 : f32
    %59 = vector.broadcast %cst_40 : f32 to vector<16x8xf32>
    %60 = arith.mulf %58, %59 : vector<16x8xf32>
    %c1_41 = arith.constant 1 : index
    %c0_42 = arith.constant 0 : index
    %c0_43 = arith.constant 0 : index
    %61 = vector.load %arg5[%c1_41, %c0_42, %c0_43] : memref<4x8x32xbf16, #tpu.memory_space<vmem>>, vector<1x8x32xbf16>
    %62 = vector.shape_cast %61 : vector<1x8x32xbf16> to vector<8x32xbf16>
    %cst_44 = arith.constant dense<0.000000e+00> : vector<8x16xf32>
    %63 = tpu.matmul %62, %3, %cst_44 {dimension_numbers = #tpu.dot_dimension_numbers<[1], [0], [0], [1], [0, 0, 1, 1], [], []>} : vector<8x32xbf16>, vector<32x16xbf16>, vector<8x16xf32> -> vector<8x16xf32>
    %c1_45 = arith.constant 1 : index
    %c0_46 = arith.constant 0 : index
    %c0_47 = arith.constant 0 : index
    %64 = vector.load %arg6[%c1_45, %c0_46, %c0_47] : memref<4x8x1xf32, #tpu.memory_space<vmem>>, vector<1x8x1xf32>
    %65 = vector.shape_cast %64 : vector<1x8x1xf32> to vector<8x1xf32>
    %66 = vector.broadcast %65 : vector<8x1xf32> to vector<8x16xf32>
    %67 = arith.addf %63, %66 : vector<8x16xf32>
    %c1_48 = arith.constant 1 : index
    %c0_49 = arith.constant 0 : index
    %c0_50 = arith.constant 0 : index
    %68 = vector.load %arg7[%c1_48, %c0_49, %c0_50] : memref<4x32x8xbf16, #tpu.memory_space<vmem>>, vector<1x32x8xbf16>
    %69 = vector.shape_cast %68 : vector<1x32x8xbf16> to vector<32x8xbf16>
    %cst_51 = arith.constant dense<0.000000e+00> : vector<16x8xf32>
    %70 = tpu.matmul %1, %69, %cst_51 {dimension_numbers = #tpu.dot_dimension_numbers<[1], [0], [0], [1], [0, 0, 1, 1], [], []>} : vector<16x32xbf16>, vector<32x8xbf16>, vector<16x8xf32> -> vector<16x8xf32>
    %c1_52 = arith.constant 1 : index
    %c0_53 = arith.constant 0 : index
    %c0_54 = arith.constant 0 : index
    %71 = vector.load %arg8[%c1_52, %c0_53, %c0_54] : memref<4x1x8xf32, #tpu.memory_space<vmem>>, vector<1x1x8xf32>
    %72 = vector.shape_cast %71 : vector<1x1x8xf32> to vector<1x8xf32>
    %73 = vector.broadcast %72 : vector<1x8xf32> to vector<16x8xf32>
    %74 = arith.addf %70, %73 : vector<16x8xf32>
    %75 = arith.truncf %60 : vector<16x8xf32> to vector<16x8xbf16>
    %76 = arith.truncf %67 : vector<8x16xf32> to vector<8x16xbf16>
    %cst_55 = arith.constant dense<0.000000e+00> : vector<16x16xf32>
    %77 = tpu.matmul %75, %76, %cst_55 {dimension_numbers = #tpu.dot_dimension_numbers<[1], [0], [0], [1], [0, 0, 1, 1], [], []>} : vector<16x8xbf16>, vector<8x16xbf16>, vector<16x16xf32> -> vector<16x16xf32>
    %78 = arith.addf %77, %4 : vector<16x16xf32>
    %cst_56 = arith.constant dense<0xFF800000> : vector<16xf32>
    %79 = vector.multi_reduction <maximumf>, %78, %cst_56 [1] : vector<16x16xf32> to vector<16xf32>
    %80 = vector.shape_cast %79 : vector<16xf32> to vector<16x1xf32>
    %81 = vector.broadcast %80 : vector<16x1xf32> to vector<16x16xf32>
    %82 = arith.subf %78, %81 : vector<16x16xf32>
    %83 = math.exp %82 : vector<16x16xf32>
    %cst_57 = arith.constant dense<0.000000e+00> : vector<16xf32>
    %84 = vector.multi_reduction <add>, %83, %cst_57 [1] : vector<16x16xf32> to vector<16xf32>
    %85 = vector.shape_cast %84 : vector<16xf32> to vector<16x1xf32>
    %86 = tpu.reciprocal %85 {approx = true} : vector<16x1xf32> -> vector<16x1xf32>
    %87 = vector.broadcast %86 : vector<16x1xf32> to vector<16x16xf32>
    %88 = arith.mulf %83, %87 : vector<16x16xf32>
    %89 = arith.truncf %88 : vector<16x16xf32> to vector<16x16xbf16>
    %90 = arith.truncf %74 : vector<16x8xf32> to vector<16x8xbf16>
    %cst_58 = arith.constant dense<0.000000e+00> : vector<16x8xf32>
    %91 = tpu.matmul %89, %90, %cst_58 {dimension_numbers = #tpu.dot_dimension_numbers<[1], [0], [0], [1], [0, 0, 1, 1], [], []>} : vector<16x16xbf16>, vector<16x8xbf16>, vector<16x8xf32> -> vector<16x8xf32>
    %92 = arith.truncf %91 : vector<16x8xf32> to vector<16x8xbf16>
    %c1_59 = arith.constant 1 : index
    %c0_60 = arith.constant 0 : index
    %c0_61 = arith.constant 0 : index
    %93 = vector.load %arg9[%c1_59, %c0_60, %c0_61] : memref<4x8x32xbf16, #tpu.memory_space<vmem>>, vector<1x8x32xbf16>
    %94 = vector.shape_cast %93 : vector<1x8x32xbf16> to vector<8x32xbf16>
    %cst_62 = arith.constant dense<0.000000e+00> : vector<16x32xf32>
    %95 = tpu.matmul %92, %94, %cst_62 {dimension_numbers = #tpu.dot_dimension_numbers<[1], [0], [0], [1], [0, 0, 1, 1], [], []>} : vector<16x8xbf16>, vector<8x32xbf16>, vector<16x32xf32> -> vector<16x32xf32>
    %96 = arith.addf %51, %95 : vector<16x32xf32>
    %c2 = arith.constant 2 : index
    %c0_63 = arith.constant 0 : index
    %c0_64 = arith.constant 0 : index
    %97 = vector.load %arg3[%c2, %c0_63, %c0_64] : memref<4x32x8xbf16, #tpu.memory_space<vmem>>, vector<1x32x8xbf16>
    %98 = vector.shape_cast %97 : vector<1x32x8xbf16> to vector<32x8xbf16>
    %cst_65 = arith.constant dense<0.000000e+00> : vector<16x8xf32>
    %99 = tpu.matmul %1, %98, %cst_65 {dimension_numbers = #tpu.dot_dimension_numbers<[1], [0], [0], [1], [0, 0, 1, 1], [], []>} : vector<16x32xbf16>, vector<32x8xbf16>, vector<16x8xf32> -> vector<16x8xf32>
    %c2_66 = arith.constant 2 : index
    %c0_67 = arith.constant 0 : index
    %c0_68 = arith.constant 0 : index
    %100 = vector.load %arg4[%c2_66, %c0_67, %c0_68] : memref<4x1x8xf32, #tpu.memory_space<vmem>>, vector<1x1x8xf32>
    %101 = vector.shape_cast %100 : vector<1x1x8xf32> to vector<1x8xf32>
    %102 = vector.broadcast %101 : vector<1x8xf32> to vector<16x8xf32>
    %103 = arith.addf %99, %102 : vector<16x8xf32>
    %cst_69 = arith.constant 0.353553385 : f32
    %104 = vector.broadcast %cst_69 : f32 to vector<16x8xf32>
    %105 = arith.mulf %103, %104 : vector<16x8xf32>
    %c2_70 = arith.constant 2 : index
    %c0_71 = arith.constant 0 : index
    %c0_72 = arith.constant 0 : index
    %106 = vector.load %arg5[%c2_70, %c0_71, %c0_72] : memref<4x8x32xbf16, #tpu.memory_space<vmem>>, vector<1x8x32xbf16>
    %107 = vector.shape_cast %106 : vector<1x8x32xbf16> to vector<8x32xbf16>
    %cst_73 = arith.constant dense<0.000000e+00> : vector<8x16xf32>
    %108 = tpu.matmul %107, %3, %cst_73 {dimension_numbers = #tpu.dot_dimension_numbers<[1], [0], [0], [1], [0, 0, 1, 1], [], []>} : vector<8x32xbf16>, vector<32x16xbf16>, vector<8x16xf32> -> vector<8x16xf32>
    %c2_74 = arith.constant 2 : index
    %c0_75 = arith.constant 0 : index
    %c0_76 = arith.constant 0 : index
    %109 = vector.load %arg6[%c2_74, %c0_75, %c0_76] : memref<4x8x1xf32, #tpu.memory_space<vmem>>, vector<1x8x1xf32>
    %110 = vector.shape_cast %109 : vector<1x8x1xf32> to vector<8x1xf32>
    %111 = vector.broadcast %110 : vector<8x1xf32> to vector<8x16xf32>
    %112 = arith.addf %108, %111 : vector<8x16xf32>
    %c2_77 = arith.constant 2 : index
    %c0_78 = arith.constant 0 : index
    %c0_79 = arith.constant 0 : index
    %113 = vector.load %arg7[%c2_77, %c0_78, %c0_79] : memref<4x32x8xbf16, #tpu.memory_space<vmem>>, vector<1x32x8xbf16>
    %114 = vector.shape_cast %113 : vector<1x32x8xbf16> to vector<32x8xbf16>
    %cst_80 = arith.constant dense<0.000000e+00> : vector<16x8xf32>
    %115 = tpu.matmul %1, %114, %cst_80 {dimension_numbers = #tpu.dot_dimension_numbers<[1], [0], [0], [1], [0, 0, 1, 1], [], []>} : vector<16x32xbf16>, vector<32x8xbf16>, vector<16x8xf32> -> vector<16x8xf32>
    %c2_81 = arith.constant 2 : index
    %c0_82 = arith.constant 0 : index
    %c0_83 = arith.constant 0 : index
    %116 = vector.load %arg8[%c2_81, %c0_82, %c0_83] : memref<4x1x8xf32, #tpu.memory_space<vmem>>, vector<1x1x8xf32>
    %117 = vector.shape_cast %116 : vector<1x1x8xf32> to vector<1x8xf32>
    %118 = vector.broadcast %117 : vector<1x8xf32> to vector<16x8xf32>
    %119 = arith.addf %115, %118 : vector<16x8xf32>
    %120 = arith.truncf %105 : vector<16x8xf32> to vector<16x8xbf16>
    %121 = arith.truncf %112 : vector<8x16xf32> to vector<8x16xbf16>
    %cst_84 = arith.constant dense<0.000000e+00> : vector<16x16xf32>
    %122 = tpu.matmul %120, %121, %cst_84 {dimension_numbers = #tpu.dot_dimension_numbers<[1], [0], [0], [1], [0, 0, 1, 1], [], []>} : vector<16x8xbf16>, vector<8x16xbf16>, vector<16x16xf32> -> vector<16x16xf32>
    %123 = arith.addf %122, %4 : vector<16x16xf32>
    %cst_85 = arith.constant dense<0xFF800000> : vector<16xf32>
    %124 = vector.multi_reduction <maximumf>, %123, %cst_85 [1] : vector<16x16xf32> to vector<16xf32>
    %125 = vector.shape_cast %124 : vector<16xf32> to vector<16x1xf32>
    %126 = vector.broadcast %125 : vector<16x1xf32> to vector<16x16xf32>
    %127 = arith.subf %123, %126 : vector<16x16xf32>
    %128 = math.exp %127 : vector<16x16xf32>
    %cst_86 = arith.constant dense<0.000000e+00> : vector<16xf32>
    %129 = vector.multi_reduction <add>, %128, %cst_86 [1] : vector<16x16xf32> to vector<16xf32>
    %130 = vector.shape_cast %129 : vector<16xf32> to vector<16x1xf32>
    %131 = tpu.reciprocal %130 {approx = true} : vector<16x1xf32> -> vector<16x1xf32>
    %132 = vector.broadcast %131 : vector<16x1xf32> to vector<16x16xf32>
    %133 = arith.mulf %128, %132 : vector<16x16xf32>
    %134 = arith.truncf %133 : vector<16x16xf32> to vector<16x16xbf16>
    %135 = arith.truncf %119 : vector<16x8xf32> to vector<16x8xbf16>
    %cst_87 = arith.constant dense<0.000000e+00> : vector<16x8xf32>
    %136 = tpu.matmul %134, %135, %cst_87 {dimension_numbers = #tpu.dot_dimension_numbers<[1], [0], [0], [1], [0, 0, 1, 1], [], []>} : vector<16x16xbf16>, vector<16x8xbf16>, vector<16x8xf32> -> vector<16x8xf32>
    %137 = arith.truncf %136 : vector<16x8xf32> to vector<16x8xbf16>
    %c2_88 = arith.constant 2 : index
    %c0_89 = arith.constant 0 : index
    %c0_90 = arith.constant 0 : index
    %138 = vector.load %arg9[%c2_88, %c0_89, %c0_90] : memref<4x8x32xbf16, #tpu.memory_space<vmem>>, vector<1x8x32xbf16>
    %139 = vector.shape_cast %138 : vector<1x8x32xbf16> to vector<8x32xbf16>
    %cst_91 = arith.constant dense<0.000000e+00> : vector<16x32xf32>
    %140 = tpu.matmul %137, %139, %cst_91 {dimension_numbers = #tpu.dot_dimension_numbers<[1], [0], [0], [1], [0, 0, 1, 1], [], []>} : vector<16x8xbf16>, vector<8x32xbf16>, vector<16x32xf32> -> vector<16x32xf32>
    %141 = arith.addf %96, %140 : vector<16x32xf32>
    %c3 = arith.constant 3 : index
    %c0_92 = arith.constant 0 : index
    %c0_93 = arith.constant 0 : index
    %142 = vector.load %arg3[%c3, %c0_92, %c0_93] : memref<4x32x8xbf16, #tpu.memory_space<vmem>>, vector<1x32x8xbf16>
    %143 = vector.shape_cast %142 : vector<1x32x8xbf16> to vector<32x8xbf16>
    %cst_94 = arith.constant dense<0.000000e+00> : vector<16x8xf32>
    %144 = tpu.matmul %1, %143, %cst_94 {dimension_numbers = #tpu.dot_dimension_numbers<[1], [0], [0], [1], [0, 0, 1, 1], [], []>} : vector<16x32xbf16>, vector<32x8xbf16>, vector<16x8xf32> -> vector<16x8xf32>
    %c3_95 = arith.constant 3 : index
    %c0_96 = arith.constant 0 : index
    %c0_97 = arith.constant 0 : index
    %145 = vector.load %arg4[%c3_95, %c0_96, %c0_97] : memref<4x1x8xf32, #tpu.memory_space<vmem>>, vector<1x1x8xf32>
    %146 = vector.shape_cast %145 : vector<1x1x8xf32> to vector<1x8xf32>
    %147 = vector.broadcast %146 : vector<1x8xf32> to vector<16x8xf32>
    %148 = arith.addf %144, %147 : vector<16x8xf32>
    %cst_98 = arith.constant 0.353553385 : f32
    %149 = vector.broadcast %cst_98 : f32 to vector<16x8xf32>
    %150 = arith.mulf %148, %149 : vector<16x8xf32>
    %c3_99 = arith.constant 3 : index
    %c0_100 = arith.constant 0 : index
    %c0_101 = arith.constant 0 : index
    %151 = vector.load %arg5[%c3_99, %c0_100, %c0_101] : memref<4x8x32xbf16, #tpu.memory_space<vmem>>, vector<1x8x32xbf16>
    %152 = vector.shape_cast %151 : vector<1x8x32xbf16> to vector<8x32xbf16>
    %cst_102 = arith.constant dense<0.000000e+00> : vector<8x16xf32>
    %153 = tpu.matmul %152, %3, %cst_102 {dimension_numbers = #tpu.dot_dimension_numbers<[1], [0], [0], [1], [0, 0, 1, 1], [], []>} : vector<8x32xbf16>, vector<32x16xbf16>, vector<8x16xf32> -> vector<8x16xf32>
    %c3_103 = arith.constant 3 : index
    %c0_104 = arith.constant 0 : index
    %c0_105 = arith.constant 0 : index
    %154 = vector.load %arg6[%c3_103, %c0_104, %c0_105] : memref<4x8x1xf32, #tpu.memory_space<vmem>>, vector<1x8x1xf32>
    %155 = vector.shape_cast %154 : vector<1x8x1xf32> to vector<8x1xf32>
    %156 = vector.broadcast %155 : vector<8x1xf32> to vector<8x16xf32>
    %157 = arith.addf %153, %156 : vector<8x16xf32>
    %c3_106 = arith.constant 3 : index
    %c0_107 = arith.constant 0 : index
    %c0_108 = arith.constant 0 : index
    %158 = vector.load %arg7[%c3_106, %c0_107, %c0_108] : memref<4x32x8xbf16, #tpu.memory_space<vmem>>, vector<1x32x8xbf16>
    %159 = vector.shape_cast %158 : vector<1x32x8xbf16> to vector<32x8xbf16>
    %cst_109 = arith.constant dense<0.000000e+00> : vector<16x8xf32>
    %160 = tpu.matmul %1, %159, %cst_109 {dimension_numbers = #tpu.dot_dimension_numbers<[1], [0], [0], [1], [0, 0, 1, 1], [], []>} : vector<16x32xbf16>, vector<32x8xbf16>, vector<16x8xf32> -> vector<16x8xf32>
    %c3_110 = arith.constant 3 : index
    %c0_111 = arith.constant 0 : index
    %c0_112 = arith.constant 0 : index
    %161 = vector.load %arg8[%c3_110, %c0_111, %c0_112] : memref<4x1x8xf32, #tpu.memory_space<vmem>>, vector<1x1x8xf32>
    %162 = vector.shape_cast %161 : vector<1x1x8xf32> to vector<1x8xf32>
    %163 = vector.broadcast %162 : vector<1x8xf32> to vector<16x8xf32>
    %164 = arith.addf %160, %163 : vector<16x8xf32>
    %165 = arith.truncf %150 : vector<16x8xf32> to vector<16x8xbf16>
    %166 = arith.truncf %157 : vector<8x16xf32> to vector<8x16xbf16>
    %cst_113 = arith.constant dense<0.000000e+00> : vector<16x16xf32>
    %167 = tpu.matmul %165, %166, %cst_113 {dimension_numbers = #tpu.dot_dimension_numbers<[1], [0], [0], [1], [0, 0, 1, 1], [], []>} : vector<16x8xbf16>, vector<8x16xbf16>, vector<16x16xf32> -> vector<16x16xf32>
    %168 = arith.addf %167, %4 : vector<16x16xf32>
    %cst_114 = arith.constant dense<0xFF800000> : vector<16xf32>
    %169 = vector.multi_reduction <maximumf>, %168, %cst_114 [1] : vector<16x16xf32> to vector<16xf32>
    %170 = vector.shape_cast %169 : vector<16xf32> to vector<16x1xf32>
    %171 = vector.broadcast %170 : vector<16x1xf32> to vector<16x16xf32>
    %172 = arith.subf %168, %171 : vector<16x16xf32>
    %173 = math.exp %172 : vector<16x16xf32>
    %cst_115 = arith.constant dense<0.000000e+00> : vector<16xf32>
    %174 = vector.multi_reduction <add>, %173, %cst_115 [1] : vector<16x16xf32> to vector<16xf32>
    %175 = vector.shape_cast %174 : vector<16xf32> to vector<16x1xf32>
    %176 = tpu.reciprocal %175 {approx = true} : vector<16x1xf32> -> vector<16x1xf32>
    %177 = vector.broadcast %176 : vector<16x1xf32> to vector<16x16xf32>
    %178 = arith.mulf %173, %177 : vector<16x16xf32>
    %179 = arith.truncf %178 : vector<16x16xf32> to vector<16x16xbf16>
    %180 = arith.truncf %164 : vector<16x8xf32> to vector<16x8xbf16>
    %cst_116 = arith.constant dense<0.000000e+00> : vector<16x8xf32>
    %181 = tpu.matmul %179, %180, %cst_116 {dimension_numbers = #tpu.dot_dimension_numbers<[1], [0], [0], [1], [0, 0, 1, 1], [], []>} : vector<16x16xbf16>, vector<16x8xbf16>, vector<16x8xf32> -> vector<16x8xf32>
    %182 = arith.truncf %181 : vector<16x8xf32> to vector<16x8xbf16>
    %c3_117 = arith.constant 3 : index
    %c0_118 = arith.constant 0 : index
    %c0_119 = arith.constant 0 : index
    %183 = vector.load %arg9[%c3_117, %c0_118, %c0_119] : memref<4x8x32xbf16, #tpu.memory_space<vmem>>, vector<1x8x32xbf16>
    %184 = vector.shape_cast %183 : vector<1x8x32xbf16> to vector<8x32xbf16>
    %cst_120 = arith.constant dense<0.000000e+00> : vector<16x32xf32>
    %185 = tpu.matmul %182, %184, %cst_120 {dimension_numbers = #tpu.dot_dimension_numbers<[1], [0], [0], [1], [0, 0, 1, 1], [], []>} : vector<16x8xbf16>, vector<8x32xbf16>, vector<16x32xf32> -> vector<16x32xf32>
    %186 = arith.addf %141, %185 : vector<16x32xf32>
    %c0_121 = arith.constant 0 : index
    %c0_122 = arith.constant 0 : index
    %187 = vector.load %arg11[%c0_121, %c0_122] : memref<16x32xf32, #tpu.memory_space<vmem>>, vector<16x32xf32>
    tpu.vector_store %arg11[%c0_121, %c0_122], %186 {strides = array<i32>} : memref<16x32xf32, #tpu.memory_space<vmem>>, vector<16x32xf32>,
    return
  }
  func.func @transform_0(%arg0: i32) -> (i32, i32) {
    %c0_i32 = arith.constant 0 : i32
    %c0_i32_0 = arith.constant 0 : i32
    return %arg0, %c0_i32 : i32, i32
  }
  func.func @transform_1(%arg0: i32) -> (i32, i32) {
    %c0_i32 = arith.constant 0 : i32
    %c0_i32_0 = arith.constant 0 : i32
    %c0_i32_1 = arith.constant 0 : i32
    return %c0_i32, %c0_i32_0 : i32, i32
  }
  func.func @transform_2(%arg0: i32) -> (i32, i32, i32) {
    %c0_i32 = arith.constant 0 : i32
    %c0_i32_0 = arith.constant 0 : i32
    %c0_i32_1 = arith.constant 0 : i32
    %c0_i32_2 = arith.constant 0 : i32
    return %c0_i32, %c0_i32_0, %c0_i32_1 : i32, i32, i32
  }
  func.func @transform_3(%arg0: i32) -> (i32, i32, i32) {
    %c0_i32 = arith.constant 0 : i32
    %c0_i32_0 = arith.constant 0 : i32
    %c0_i32_1 = arith.constant 0 : i32
    %c0_i32_2 = arith.constant 0 : i32
    return %c0_i32, %c0_i32_0, %c0_i32_1 : i32, i32, i32
  }
  func.func @transform_4(%arg0: i32) -> (i32, i32, i32) {
    %c0_i32 = arith.constant 0 : i32
    %c0_i32_0 = arith.constant 0 : i32
    %c0_i32_1 = arith.constant 0 : i32
    %c0_i32_2 = arith.constant 0 : i32
    return %c0_i32, %c0_i32_0, %c0_i32_1 : i32, i32, i32
  }
  func.func @transform_5(%arg0: i32) -> (i32, i32, i32) {
    %c0_i32 = arith.constant 0 : i32
    %c0_i32_0 = arith.constant 0 : i32
    %c0_i32_1 = arith.constant 0 : i32
    %c0_i32_2 = arith.constant 0 : i32
    return %c0_i32, %c0_i32_0, %c0_i32_1 : i32, i32, i32
  }
  func.func @transform_6(%arg0: i32) -> (i32, i32, i32) {
    %c0_i32 = arith.constant 0 : i32
    %c0_i32_0 = arith.constant 0 : i32
    %c0_i32_1 = arith.constant 0 : i32
    %c0_i32_2 = arith.constant 0 : i32
    return %c0_i32, %c0_i32_0, %c0_i32_1 : i32, i32, i32
  }
  func.func @transform_7(%arg0: i32) -> (i32, i32, i32) {
    %c0_i32 = arith.constant 0 : i32
    %c0_i32_0 = arith.constant 0 : i32
    %c0_i32_1 = arith.constant 0 : i32
    %c0_i32_2 = arith.constant 0 : i32
    return %c0_i32, %c0_i32_0, %c0_i32_1 : i32, i32, i32
  }
  func.func @transform_8(%arg0: i32) -> (i32, i32, i32) {
    %c0_i32 = arith.constant 0 : i32
    %c0_i32_0 = arith.constant 0 : i32
    %c0_i32_1 = arith.constant 0 : i32
    %c0_i32_2 = arith.constant 0 : i32
    return %c0_i32, %c0_i32_0, %c0_i32_1 : i32, i32, i32
  }
  func.func @transform_9(%arg0: i32) -> (i32, i32) {
    %c0_i32 = arith.constant 0 : i32
    %c0_i32_0 = arith.constant 0 : i32
    %c0_i32_1 = arith.constant 0 : i32
    return %c0_i32, %c0_i32_0 : i32, i32
  }
  func.func @transform_10(%arg0: i32) -> (i32, i32) {
    %c0_i32 = arith.constant 0 : i32
    %c0_i32_0 = arith.constant 0 : i32
    return %arg0, %c0_i32 : i32, i32
  }
}

</mosaic_0001>

<bundles_post_ra>
// kernel: tpu_custom_call.1
= control target key start
LH: loop header
LB: loop body
LE: loop exit
PB: predicated region body
PF: predicated region fallthrough
CT: control target
= control target key end

     0   :  { %s1347_s0 = inlined_call_operand.vmem [shape: f32[16,32], index: 0, kind: input, shape index: {}]   ;;  %s1348_s1 = inlined_call_operand.vmem [shape: f32[16,16], index: 1, kind: input, shape index: {}]   ;;  %s1349_s2 = inlined_call_operand.vmem [shape: bf16[4,32,8], index: 2, kind: input, shape index: {}]   ;;  %s1350_s3 = inlined_call_operand.vmem [shape: f32[4,1,8], index: 3, kind: input, shape index: {}]   ;;  %s1351_s4 = inlined_call_operand.vmem [shape: bf16[4,8,32], index: 4, kind: input, shape index: {}]   ;;  %s1352_s5 = inlined_call_operand.vmem [shape: f32[4,8,1], index: 5, kind: input, shape index: {}]   ;;  %s1353_s6 = inlined_call_operand.vmem [shape: bf16[4,32,8], index: 6, kind: input, shape index: {}]   ;;  %s1354_s7 = inlined_call_operand.vmem [shape: f32[4,1,8], index: 7, kind: input, shape index: {}]   ;;  %s1355_s8 = inlined_call_operand.vmem [shape: bf16[4,8,32], index: 8, kind: input, shape index: {}]   ;;  %s1356_s9 = inlined_call_operand.vmem [shape: f32[1,32], index: 9, kind: input, shape index: {}]   ;;  %s1357_s10 = inlined_call_operand.hbm [shape: f32[16,32], index: 10, kind: output, shape index: {}]  }
   0x1   :  { %v37_v0 = vld [vmem:[%s1347_s0] sm:$0xff]  ;;  %v38_v1 = vld [vmem:[%s1347_s0 + $0x8] sm:$0xff] }
   0x2   :  { %40 = vxpose.xlu0.b32.start [1/2] (short) (narrow) %v37_v0, 32  ;;  %v1131_v2 = vpack.c.bf16 %v38_v1, %v37_v0 }
   0x3   :  { %15 = vsyncpa [#allocation3], 0  ;;  %v976_v3 = vld [vmem:[%s1349_s2 + $0x8] sm:$0xff]  ;;  %v975_v4 = vld [vmem:[%s1349_s2] sm:$0xff]  ;;  %vm97_vm0 = vcmask 261120   ;;  %v1066_v9 = vmov 0  }
   0x4   :  { %107 = vmatpush.bf16.msra.mxu0 %v976_v3  ;;  %v978_v5 = vld [vmem:[%s1353_s6 + $0x8] sm:$0xff]  ;;  %v977_v6 = vld [vmem:[%s1353_s6] sm:$0xff]  ;;  %996 = vset.pattern.permute.xlu1 %v1066_v9  ;;  %vm180_vm1 = vcmask 1043456   ;;  %vm176_vm2 = vcmask 64512   ;;  %vm198_vm3 = vcmask 130048   ;;  %v980_v55 = vld [vmem:[%s1349_s2 + $0x18] sm:$0xff] }
   0x5   :  { %166 = vmatpush.bf16.msra.mxu2 %v978_v5  ;;  %v118_v8 = vld [vmem:[%s1352_s5] sm:$0xff]  ;;  %997 = vset.pattern.permute.xlu2 %v1066_v9  ;;  %v1179_v34 = vld [vmem:[%s1348_s1 + $0x8] sm:$0xff]  ;;  %v979_v58 = vld [vmem:[%s1349_s2 + $0x10] sm:$0xff]  ;;  %s836_s24 = sshll.u32 %s1357_s10, 4  ;;  %s1068_s25 = smov 128   ;;  %s837_s24 = int_to_ptr.hbm [resolvable:$true] %s836_s24 }
   0x6   :  { %121 = vperm.xlu1 %996, %v118_v8   ;;  %v117_v15 = vld [vmem:[%s1351_s4] sm:$0xf]  ;;  %v884_v54 = vld [vmem:[%s1351_s4 + $0x4] sm:$0xf]  ;;  %v885_v56 = vld [vmem:[%s1352_s5 + $0x8] sm:$0xff]  ;;  %s1069_s26 = smov 8  }
   0x7   :  { %v999_v17 = vld [vmem:[%s1350_s3] ss:$0 sm:$0xff] }
   0x8   :  { %108 = vmatpush.bf16.msra.mxu0 %v975_v4  ;;  %v1172_v30 = vld [vmem:[%s1348_s1] sm:$0xff] }
   0x9   :  { %167 = vmatpush.bf16.msra.mxu2 %v977_v6  ;;  %v1000_v39 = vld [vmem:[%s1354_s7] ss:$0 sm:$0xff] }
   0xa   :  { %41 = vxpose.xlu0.b32.end [2/2] (short) (narrow) %v38_v1, 32  ;;  %v241_v57 = vld [vmem:[%s1355_s8] sm:$0xf] }
   0xb   :  { %856 = vmatmul.msk.bf16.vlgmr.msra.gmra.mxu0 %vm97_vm0, %v1131_v2  ;;  %v246_v59 = vsel %vm180_vm1, %v241_v57, 0 }
   0xc   :  { %866 = vmatmul.msk.bf16.vlgmr.msra.gmra.mxu2 %vm97_vm0, %v1131_v2  ;;  %255 = vmatpush.bf16.msrb.mxu0 %v246_v59 }
  0x71   :  { %998 = vset.pattern.permute.xlu0 %v1066_v9 }
  0x78   :  { %v122_v19 = vpop.permute.xlu1 %121 }
  0x88   :  { %v110_v16 = vpop.f32.mrf.mxu0 }
  0x89   :  { %v111_v20 = vadd.f32 %v999_v17, %v110_v16  ;;  %v1001_v16 = vld [vmem:[%s1350_s3 + $0x1] ss:$0 sm:$0xff] }
  0x8b   :  { %v115_v24 = vmul.f32 0.35355338, %v111_v20 }
  0x8f   :  { %v169_v38 = vpop.f32.mrf.mxu2 }
  0x90   :  { %v112_v18 = vpop.f32.mrf.mxu0  ;;  %v170_v40 = vadd.f32 %v1000_v39, %v169_v38 }
  0x91   :  { %v113_v21 = vadd.f32 %v999_v17, %v112_v18 }
  0x93   :  { %v116_v25 = vmul.f32 0.35355338, %v113_v21 }
  0x95   :  { %v174_v28 = vpack.c.bf16 %v116_v25, %v115_v24  ;;  %v981_v24 = vld [vmem:[%s1353_s6 + $0x10] sm:$0xff] }
  0x97   :  { %v171_v41 = vpop.f32.mrf.mxu2 }
  0x98   :  { %v172_v42 = vadd.f32 %v1000_v39, %v171_v41 }
  0x9a   :  { %v222_v44 = vpack.c.bf16 %v172_v42, %v170_v40 }
  0xa6   :  { %v56_v7 = vpop.trf.xlu0 }
  0xae   :  { %v57_v10 = vpop.trf.xlu0 }
  0xaf   :  { %v1156_v14 = vpack.c.bf16 %v57_v10, %v56_v7 }
  0xb6   :  { %v58_v11 = vpop.trf.xlu0 }
  0xbe   :  { %v59_v12 = vpop.trf.xlu0 }
  0xbf   :  { %v1152_v13 = vpack.c.bf16 %v59_v12, %v58_v11 }
  0xc1   :  { %133 = vmatpush.bf16.msra.mxu1 %v1152_v13  ;;  %323 = vmatpush.bf16.msrb.mxu2 %v1152_v13 }
  0xc5   :  { %134 = vmatpush.bf16.msra.mxu1 %v1156_v14  ;;  %324 = vmatpush.bf16.msrb.mxu2 %v1156_v14 }
  0xc8   :  { %857 = vmatmul.msk.bf16.vlgmr.msra.gmra.mxu1 %vm97_vm0, %v117_v15  ;;  %886 = vmatmul.msk.bf16.vlgmr.msrb.gmra.mxu2 %vm97_vm0, %v884_v54  ;;  %v983_v54 = vld [vmem:[%s1349_s2 + $0x20] sm:$0xff] }
  0xc9   :  { %295 = vmatpush.bf16.msrb.mxu1 %v980_v55 }
  0xcd   :  { %296 = vmatpush.bf16.msrb.mxu1 %v979_v58  ;;  %v903_v58 = vld [vmem:[%s1355_s8 + $0x4] sm:$0xf] }
  0xce   :  { %v436_v59 = vsel %vm180_vm1, %v903_v58, 0  ;;  %v987_v58 = vld [vmem:[%s1349_s2 + $0x30] sm:$0xff] }
  0xcf   :  { %445 = vmatpush.bf16.msra.mxu2 %v436_v59 }
  0xd8   :  { %883 = vmatmul.msk.bf16.vlgmr.msrb.gmra.mxu1 %vm97_vm0, %v1131_v2 }
 0x145   :  { %v136_v22 = vpop.f32.mrf.mxu1 }
 0x146   :  { %v137_v23 = vadd.f32 %v136_v22, %v122_v19 }
 0x148   :  { %v175_v26 = vpack.c.bf16 %v137_v23, %v137_v23  ;;  %v982_v23 = vld [vmem:[%s1353_s6 + $0x18] sm:$0xff] }
 0x14a   :  { %v182_v27 = vsel %vm180_vm1, %v175_v26, 0 }
 0x14b   :  { %191 = vmatpush.bf16.msra.mxu3 %v182_v27  ;;  %v326_v4 = vpop.f32.mrf.mxu2 }
 0x14d   :  { %v138_v29 = vpop.f32.mrf.mxu1 }
 0x14e   :  { %867 = vmatmul.msk.bf16.vlgmr.msra.gmra.mxu3 %vm176_vm2, %v174_v28 }
 0x14f   :  { %233 = vmatpush.bf16.msrb.mxu3 %v222_v44 }
 0x153   :  { %v328_v9 = vpop.f32.mrf.mxu2  ;;  %358 = vmatpush.bf16.msra.mxu3 %v982_v23 }
 0x155   :  { %v298_v11 = vpop.f32.mrf.mxu1 }
 0x156   :  { %v299_v18 = vadd.f32 %v1001_v16, %v298_v11  ;;  %v1004_v11 = vld [vmem:[%s1350_s3 + $0x2] ss:$0 sm:$0xff] }
 0x157   :  { %359 = vmatpush.bf16.msra.mxu3 %v981_v24 }
 0x158   :  { %v303_v20 = vmul.f32 0.35355338, %v299_v18 }
 0x15d   :  { %v300_v17 = vpop.f32.mrf.mxu1 }
 0x15e   :  { %v301_v19 = vadd.f32 %v1001_v16, %v300_v17 }
 0x160   :  { %v304_v21 = vmul.f32 0.35355338, %v301_v19 }
 0x162   :  { %v366_v22 = vpack.c.bf16 %v304_v21, %v303_v20  ;;  %v1002_v20 = vld [vmem:[%s1356_s9] ss:$0 sm:$0xff] }
 0x1d1   :  { %v193_v31 = vpop.f32.mrf.mxu3 }
 0x1d2   :  { %v194_v32 = vadd.f32 %v193_v31, %v1172_v30 }
 0x1d4   :  { %v199_v33 = vsel %vm198_vm3, %v194_v32, -inf }
 0x1d5   :  { %200 = vmax.xlane.f32.xlu1 %v199_v33 }
 0x1d9   :  { %v195_v35 = vpop.f32.mrf.mxu3 }
 0x1da   :  { %v196_v36 = vadd.f32 %v195_v35, %v1179_v34  ;;  %v919_v35 = vld [vmem:[%s1351_s4 + $0x8] sm:$0xf] }
 0x1dc   :  { %v202_v37 = vsel %vm198_vm3, %v196_v36, -inf }
 0x1dd   :  { %203 = vmax.xlane.f32.xlu2 %v202_v37 }
 0x248   :  { %v201_v43 = vpop.xlane.xlu1 %200 }
 0x249   :  { %v205_v45 = vsub.f32 %v194_v32, %v201_v43 }
 0x24b   :  { %v207_v46 = vmul.f32 1.442695, %v205_v45  ;;  %v1003_v45 = vld [vmem:[%s1354_s7 + $0x1] ss:$0 sm:$0xff] }
 0x24d   :  { %1008 = vpow2.f32 %v207_v46 }
 0x250   :  { %v204_v47 = vpop.xlane.xlu2 %203 }
 0x251   :  { %v206_v48 = vsub.f32 %v196_v36, %v204_v47 }
 0x253   :  { %v1009_v49 = vpop.eup %1008  ;;  %v209_v50 = vmul.f32 1.442695, %v206_v48 }
 0x254   :  { %v211_v51 = vsel %vm198_vm3, %v1009_v49, 0.0 }
 0x255   :  { %1010 = vpow2.f32 %v209_v50  ;;  %212 = vadd.xlane.f32.xlu2 %v211_v51 }
 0x25b   :  { %v1011_v52 = vpop.eup %1010 }
 0x25c   :  { %v214_v53 = vsel %vm198_vm3, %v1011_v52, 0.0 }
 0x25d   :  { %215 = vadd.xlane.f32.xlu0 %v214_v53  ;;  %v984_v53 = vld [vmem:[%s1349_s2 + $0x28] sm:$0xff] }
 0x26d   :  { %311 = vperm.xlu2 %997, %v885_v56  }
 0x2c8   :  { %v213_v60 = vpop.xlane.xlu2 %212 }
 0x2c9   :  { %1012 = vrcp.f32 %v213_v60 }
 0x2cf   :  { %v1013_v62 = vpop.eup %1012 }
 0x2d0   :  { %v216_v61 = vpop.xlane.xlu0 %215  ;;  %v219_v0 = vmul.f32 %v1013_v62, %v1009_v49  ;;  %v312_v5 = vpop.permute.xlu2 %311 }
 0x2d1   :  { %1014 = vrcp.f32 %v216_v61  ;;  %v327_v6 = vadd.f32 %v326_v4, %v312_v5 }
 0x2d3   :  { %v367_v7 = vpack.c.bf16 %v327_v6, %v327_v6 }
 0x2d5   :  { %v372_v8 = vsel %vm180_vm1, %v367_v7, 0 }
 0x2d6   :  { %381 = vmatpush.bf16.msra.mxu0 %v372_v8 }
 0x2d7   :  { %v1015_v63 = vpop.eup %1014 }
 0x2d8   :  { %v220_v1 = vmul.f32 %v1015_v63, %v1011_v52  ;;  %v920_v52 = vld [vmem:[%s1352_s5 + $0x10] sm:$0xff] }
 0x2da   :  { %v221_v3 = vpack.c.bf16 %v220_v1, %v219_v0 }
 0x2dc   :  { %868 = vmatmul.msk.bf16.vlgmr.msrb.gmra.mxu3 %vm198_vm3, %v221_v3 }
 0x2dd   :  { %482 = vmatpush.bf16.msrb.mxu3 %v984_v53 }
 0x2e1   :  { %483 = vmatpush.bf16.msrb.mxu3 %v983_v54  ;;  %v938_v54 = vld [vmem:[%s1355_s8 + $0x8] sm:$0xf] }
 0x2ec   :  { %900 = vmatmul.msk.bf16.vlgmr.msra.gmra.mxu3 %vm97_vm0, %v1131_v2 }
 0x2fc   :  { %918 = vmatmul.msk.bf16.vlgmr.msrb.gmra.mxu3 %vm97_vm0, %v1131_v2 }
 0x35f   :  { %v235_v10 = vpop.f32.mrf.mxu3 }
 0x367   :  { %v237_v12 = vpop.f32.mrf.mxu3 }
 0x368   :  { %v240_v15 = vpack.c.bf16 %v237_v12, %v235_v10 }
 0x36a   :  { %869 = vmatmul.msk.bf16.vlgmr.msrb.gmra.mxu0 %vm176_vm2, %v240_v15 }
 0x36b   :  { %510 = vmatpush.bf16.msrb.mxu0 %v1152_v13 }
 0x36f   :  { %511 = vmatpush.bf16.msrb.mxu0 %v1156_v14  ;;  %v361_v44 = vpop.f32.mrf.mxu3 }
 0x370   :  { %v362_v48 = vadd.f32 %v1003_v45, %v361_v44 }
 0x377   :  { %v363_v49 = vpop.f32.mrf.mxu3 }
 0x378   :  { %v364_v50 = vadd.f32 %v1003_v45, %v363_v49 }
 0x37a   :  { %901 = vmatmul.msk.bf16.vlgmr.msra.gmra.mxu0 %vm176_vm2, %v366_v22  ;;  %v411_v51 = vpack.c.bf16 %v364_v50, %v362_v48 }
 0x37c   :  { %422 = vmatpush.bf16.msra.mxu1 %v411_v51 }
 0x37f   :  { %v485_v8 = vpop.f32.mrf.mxu3 }
 0x380   :  { %v486_v15 = vadd.f32 %v1004_v11, %v485_v8 }
 0x382   :  { %v490_v17 = vmul.f32 0.35355338, %v486_v15 }
 0x387   :  { %v487_v12 = vpop.f32.mrf.mxu3 }
 0x388   :  { %v488_v16 = vadd.f32 %v1004_v11, %v487_v12  ;;  %v1006_v11 = vld [vmem:[%s1350_s3 + $0x3] ss:$0 sm:$0xff] }
 0x38a   :  { %921 = vmatmul.msk.bf16.vlgmr.msrb.gmra.mxu0 %vm97_vm0, %v919_v35  ;;  %v491_v18 = vmul.f32 0.35355338, %v488_v16 }
 0x38c   :  { %v553_v19 = vpack.c.bf16 %v491_v18, %v490_v17 }
 0x3e7   :  { %v1222_v25 = vpop.f32.mrf.mxu0 }
 0x3e8   :  { %v265_v21 = vadd.f32 %v1002_v20, %v1222_v25 }
 0x3ef   :  { %v1226_v26 = vpop.f32.mrf.mxu0 }
 0x3f0   :  { %v266_v24 = vadd.f32 %v1002_v20, %v1226_v26  ;;  %v990_v20 = vld [vmem:[%s1353_s6 + $0x38] sm:$0xff] }
 0x3f7   :  { %v383_v27 = vpop.f32.mrf.mxu0 }
 0x3f8   :  { %v384_v28 = vadd.f32 %v383_v27, %v1172_v30 }
 0x3fa   :  { %v388_v29 = vsel %vm198_vm3, %v384_v28, -inf }
 0x3fb   :  { %389 = vmax.xlane.f32.xlu2 %v388_v29 }
 0x3ff   :  { %v385_v31 = vpop.f32.mrf.mxu0 }
 0x400   :  { %v386_v32 = vadd.f32 %v385_v31, %v1179_v34 }
 0x402   :  { %v391_v33 = vsel %vm198_vm3, %v386_v32, -inf }
 0x403   :  { %392 = vmax.xlane.f32.xlu1 %v391_v33 }
 0x407   :  { %v513_v55 = vpop.f32.mrf.mxu0 }
 0x40f   :  { %v515_v56 = vpop.f32.mrf.mxu0 }
 0x46e   :  { %v390_v36 = vpop.xlane.xlu2 %389 }
 0x46f   :  { %v394_v37 = vsub.f32 %v384_v28, %v390_v36  ;;  %v954_v36 = vld [vmem:[%s1351_s4 + $0xc] sm:$0xf] }
 0x471   :  { %v396_v38 = vmul.f32 1.442695, %v394_v37 }
 0x473   :  { %1016 = vpow2.f32 %v396_v38 }
 0x476   :  { %v393_v39 = vpop.xlane.xlu1 %392 }
 0x477   :  { %v395_v40 = vsub.f32 %v386_v32, %v393_v39 }
 0x479   :  { %v1017_v41 = vpop.eup %1016  ;;  %v398_v42 = vmul.f32 1.442695, %v395_v40 }
 0x47a   :  { %v400_v43 = vsel %vm198_vm3, %v1017_v41, 0.0 }
 0x47b   :  { %1018 = vpow2.f32 %v398_v42  ;;  %401 = vadd.xlane.f32.xlu1 %v400_v43 }
 0x481   :  { %v1019_v46 = vpop.eup %1018 }
 0x482   :  { %v403_v47 = vsel %vm198_vm3, %v1019_v46, 0.0 }
 0x483   :  { %404 = vadd.xlane.f32.xlu1 %v403_v47 }
 0x49c   :  { %498 = vperm.xlu1 %996, %v920_v52   ;;  %v955_v52 = vld [vmem:[%s1352_s5 + $0x18] sm:$0xff] }
 0x4ee   :  { %v402_v57 = vpop.xlane.xlu1 %401 }
 0x4ef   :  { %1020 = vrcp.f32 %v402_v57  ;;  %v988_v57 = vld [vmem:[%s1349_s2 + $0x38] sm:$0xff] }
 0x4f5   :  { %v1021_v61 = vpop.eup %1020 }
 0x4f6   :  { %v405_v60 = vpop.xlane.xlu1 %404  ;;  %v408_v63 = vmul.f32 %v1021_v61, %v1017_v41  ;;  %v1005_v41 = vld [vmem:[%s1354_s7 + $0x2] ss:$0 sm:$0xff] }
 0x4f7   :  { %1022 = vrcp.f32 %v405_v60 }
 0x4fd   :  { %v1023_v62 = vpop.eup %1022 }
 0x4fe   :  { %v409_v0 = vmul.f32 %v1023_v62, %v1019_v46 }
 0x500   :  { %v410_v1 = vpack.c.bf16 %v409_v0, %v408_v63 }
 0x502   :  { %902 = vmatmul.msk.bf16.vlgmr.msra.gmra.mxu1 %vm198_vm3, %v410_v1 }
 0x50e   :  { %v499_v3 = vpop.permute.xlu1 %498 }
 0x50f   :  { %v514_v4 = vadd.f32 %v513_v55, %v499_v3  ;;  %v623_v55 = vsel %vm180_vm1, %v938_v54, 0 }
 0x510   :  { %632 = vmatpush.bf16.msra.mxu0 %v623_v55 }
 0x511   :  { %v554_v5 = vpack.c.bf16 %v514_v4, %v514_v4 }
 0x513   :  { %v559_v6 = vsel %vm180_vm1, %v554_v5, 0 }
 0x514   :  { %568 = vmatpush.bf16.msrb.mxu2 %v559_v6 }
 0x57f   :  { %v424_v7 = vpop.f32.mrf.mxu1 }
 0x587   :  { %v426_v9 = vpop.f32.mrf.mxu1 }
 0x588   :  { %v429_v10 = vpack.c.bf16 %v426_v9, %v424_v7 }
 0x58a   :  { %904 = vmatmul.msk.bf16.vlgmr.msra.gmra.mxu2 %vm176_vm2, %v429_v10 }
 0x58b   :  { %697 = vmatpush.bf16.msra.mxu2 %v1152_v13  ;;  %v986_v13 = vld [vmem:[%s1353_s6 + $0x28] sm:$0xff] }
 0x58c   :  { %545 = vmatpush.bf16.msrb.mxu1 %v986_v13  ;;  %v989_v13 = vld [vmem:[%s1353_s6 + $0x30] sm:$0xff] }
 0x58f   :  { %698 = vmatpush.bf16.msra.mxu2 %v1156_v14  ;;  %v985_v14 = vld [vmem:[%s1353_s6 + $0x20] sm:$0xff] }
 0x590   :  { %546 = vmatpush.bf16.msrb.mxu1 %v985_v14 }
 0x593   :  { %935 = vmatmul.msk.bf16.vlgmr.msrb.gmra.mxu1 %vm97_vm0, %v1131_v2 }
 0x594   :  { %669 = vmatpush.bf16.msra.mxu1 %v988_v57 }
 0x598   :  { %670 = vmatpush.bf16.msra.mxu1 %v987_v58 }
 0x59a   :  { %936 = vmatmul.msk.bf16.vlgmr.msrb.gmra.mxu2 %vm176_vm2, %v553_v19 }
 0x5a3   :  { %953 = vmatmul.msk.bf16.vlgmr.msra.gmra.mxu1 %vm97_vm0, %v1131_v2 }
 0x5aa   :  { %956 = vmatmul.msk.bf16.vlgmr.msra.gmra.mxu2 %vm97_vm0, %v954_v36 }
 0x60d   :  { %v447_v22 = vpop.f32.mrf.mxu2 }
 0x60e   :  { %v1275_v23 = vadd.f32 %v447_v22, %v265_v21 }
 0x610   :  { %v548_v39 = vpop.f32.mrf.mxu1 }
 0x611   :  { %v549_v46 = vadd.f32 %v1005_v41, %v548_v39 }
 0x615   :  { %v449_v27 = vpop.f32.mrf.mxu2 }
 0x616   :  { %v1280_v28 = vadd.f32 %v449_v27, %v266_v24 }
 0x618   :  { %v550_v47 = vpop.f32.mrf.mxu1 }
 0x619   :  { %v551_v48 = vadd.f32 %v1005_v41, %v550_v47 }
 0x61b   :  { %v598_v49 = vpack.c.bf16 %v551_v48, %v549_v46 }
 0x61d   :  { %v570_v29 = vpop.f32.mrf.mxu2  ;;  %609 = vmatpush.bf16.msra.mxu3 %v598_v49 }
 0x61e   :  { %v571_v31 = vadd.f32 %v570_v29, %v1172_v30 }
 0x620   :  { %v575_v32 = vsel %vm198_vm3, %v571_v31, -inf  ;;  %v672_v8 = vpop.f32.mrf.mxu1 }
 0x621   :  { %576 = vmax.xlane.f32.xlu2 %v575_v32  ;;  %v673_v15 = vadd.f32 %v1006_v11, %v672_v8  ;;  %732 = vmatpush.bf16.msrb.mxu3 %v990_v20 }
 0x623   :  { %v677_v17 = vmul.f32 0.35355338, %v673_v15 }
 0x625   :  { %v572_v33 = vpop.f32.mrf.mxu2  ;;  %733 = vmatpush.bf16.msrb.mxu3 %v989_v13 }
 0x626   :  { %v573_v25 = vadd.f32 %v572_v33, %v1179_v34 }
 0x628   :  { %v578_v35 = vsel %vm198_vm3, %v573_v25, -inf  ;;  %v674_v12 = vpop.f32.mrf.mxu1 }
 0x629   :  { %579 = vmax.xlane.f32.xlu2 %v578_v35  ;;  %v675_v16 = vadd.f32 %v1006_v11, %v674_v12 }
 0x62b   :  { %v678_v18 = vmul.f32 0.35355338, %v675_v16 }
 0x62d   :  { %v700_v53 = vpop.f32.mrf.mxu2  ;;  %v740_v19 = vpack.c.bf16 %v678_v18, %v677_v17 }
 0x635   :  { %v702_v56 = vpop.f32.mrf.mxu2 }
 0x694   :  { %v577_v26 = vpop.xlane.xlu2 %576 }
 0x695   :  { %v581_v37 = vsub.f32 %v571_v31, %v577_v26 }
 0x697   :  { %v583_v38 = vmul.f32 1.442695, %v581_v37 }
 0x699   :  { %1024 = vpow2.f32 %v583_v38 }
 0x69c   :  { %v580_v40 = vpop.xlane.xlu2 %579 }
 0x69d   :  { %v582_v42 = vsub.f32 %v573_v25, %v580_v40 }
 0x69f   :  { %v1025_v43 = vpop.eup %1024  ;;  %v585_v44 = vmul.f32 1.442695, %v582_v42 }
 0x6a0   :  { %v587_v45 = vsel %vm198_vm3, %v1025_v43, 0.0 }
 0x6a1   :  { %1026 = vpow2.f32 %v585_v44  ;;  %588 = vadd.xlane.f32.xlu2 %v587_v45  ;;  %v973_v45 = vld [vmem:[%s1355_s8 + $0xc] sm:$0xf]  ;;  %s1067_s8 = smov [#allocation2]  }
 0x6a2   :  { %v810_v46 = vsel %vm180_vm1, %v973_v45, 0  ;;  %s834_s22 = sshll.u32 %s1067_s8, 4  ;;  %s835_s22 = int_to_ptr.vmem [resolvable:$true] %s834_s22 }
 0x6a3   :  { %819 = vmatpush.bf16.msrb.mxu2 %v810_v46 }
 0x6a7   :  { %v1027_v50 = vpop.eup %1026 }
 0x6a8   :  { %v590_v51 = vsel %vm198_vm3, %v1027_v50, 0.0 }
 0x6a9   :  { %591 = vadd.xlane.f32.xlu1 %v590_v51 }
 0x6b9   :  { %685 = vperm.xlu2 %997, %v955_v52  }
 0x714   :  { %v589_v59 = vpop.xlane.xlu2 %588 }
 0x715   :  { %1028 = vrcp.f32 %v589_v59 }
 0x71b   :  { %v1029_v0 = vpop.eup %1028 }
 0x71c   :  { %v592_v60 = vpop.xlane.xlu1 %591  ;;  %v686_v61 = vpop.permute.xlu2 %685  ;;  %v595_v4 = vmul.f32 %v1029_v0, %v1025_v43 }
 0x71d   :  { %1030 = vrcp.f32 %v592_v60  ;;  %v701_v62 = vadd.f32 %v700_v53, %v686_v61 }
 0x71f   :  { %v741_v63 = vpack.c.bf16 %v701_v62, %v701_v62 }
 0x721   :  { %v746_v1 = vsel %vm180_vm1, %v741_v63, 0 }
 0x722   :  { %755 = vmatpush.bf16.msrb.mxu0 %v746_v1 }
 0x723   :  { %v1031_v3 = vpop.eup %1030 }
 0x724   :  { %v596_v5 = vmul.f32 %v1031_v3, %v1027_v50 }
 0x726   :  { %v597_v6 = vpack.c.bf16 %v596_v5, %v595_v4 }
 0x728   :  { %937 = vmatmul.msk.bf16.vlgmr.msra.gmra.mxu3 %vm198_vm3, %v597_v6 }
 0x738   :  { %970 = vmatmul.msk.bf16.vlgmr.msrb.gmra.mxu3 %vm97_vm0, %v1131_v2  ;;  %v1007_v2 = vld [vmem:[%s1354_s7 + $0x3] ss:$0 sm:$0xff] }
 0x7ab   :  { %v611_v7 = vpop.f32.mrf.mxu3 }
 0x7b3   :  { %v613_v9 = vpop.f32.mrf.mxu3 }
 0x7b4   :  { %v616_v10 = vpack.c.bf16 %v613_v9, %v611_v7 }
 0x7b6   :  { %939 = vmatmul.msk.bf16.vlgmr.msra.gmra.mxu0 %vm176_vm2, %v616_v10 }
 0x7bb   :  { %v735_v36 = vpop.f32.mrf.mxu3 }
 0x7c3   :  { %v737_v38 = vpop.f32.mrf.mxu3 }
 0x7c4   :  { %v738_v39 = vadd.f32 %v1007_v2, %v737_v38 }
 0x7c6   :  { %971 = vmatmul.msk.bf16.vlgmr.msrb.gmra.mxu0 %vm176_vm2, %v740_v19 }
 0x833   :  { %v634_v14 = vpop.f32.mrf.mxu0 }
 0x834   :  { %v639_v21 = vadd.f32 %v634_v14, %v1275_v23 }
 0x83b   :  { %v636_v22 = vpop.f32.mrf.mxu0 }
 0x83c   :  { %v640_v24 = vadd.f32 %v636_v22, %v1280_v28 }
 0x843   :  { %v757_v27 = vpop.f32.mrf.mxu0 }
 0x844   :  { %v758_v29 = vadd.f32 %v757_v27, %v1172_v30  ;;  %v736_v30 = vadd.f32 %v1007_v2, %v735_v36 }
 0x846   :  { %v762_v31 = vsel %vm198_vm3, %v758_v29, -inf  ;;  %v785_v42 = vpack.c.bf16 %v738_v39, %v736_v30 }
 0x847   :  { %763 = vmax.xlane.f32.xlu2 %v762_v31 }
 0x848   :  { %796 = vmatpush.bf16.msrb.mxu1 %v785_v42 }
 0x84b   :  { %v759_v32 = vpop.f32.mrf.mxu0 }
 0x84c   :  { %v760_v33 = vadd.f32 %v759_v32, %v1179_v34 }
 0x84e   :  { %v765_v25 = vsel %vm198_vm3, %v760_v33, -inf }
 0x84f   :  { %766 = vmax.xlane.f32.xlu1 %v765_v25 }
 0x8ba   :  { %v764_v23 = vpop.xlane.xlu2 %763 }
 0x8bb   :  { %v768_v35 = vsub.f32 %v758_v29, %v764_v23 }
 0x8bd   :  { %v770_v26 = vmul.f32 1.442695, %v768_v35 }
 0x8bf   :  { %1032 = vpow2.f32 %v770_v26 }
 0x8c2   :  { %v767_v28 = vpop.xlane.xlu1 %766 }
 0x8c3   :  { %v769_v37 = vsub.f32 %v760_v33, %v767_v28 }
 0x8c5   :  { %v1033_v40 = vpop.eup %1032  ;;  %v772_v41 = vmul.f32 1.442695, %v769_v37 }
 0x8c6   :  { %v774_v34 = vsel %vm198_vm3, %v1033_v40, 0.0 }
 0x8c7   :  { %1034 = vpow2.f32 %v772_v41  ;;  %775 = vadd.xlane.f32.xlu0 %v774_v34 }
 0x8cd   :  { %v1035_v43 = vpop.eup %1034 }
 0x8ce   :  { %v777_v44 = vsel %vm198_vm3, %v1035_v43, 0.0 }
 0x8cf   :  { %778 = vadd.xlane.f32.xlu1 %v777_v44 }
 0x93a   :  { %v776_v47 = vpop.xlane.xlu0 %775 }
 0x93b   :  { %1036 = vrcp.f32 %v776_v47 }
 0x941   :  { %v1037_v49 = vpop.eup %1036 }
 0x942   :  { %v779_v48 = vpop.xlane.xlu1 %778  ;;  %v782_v51 = vmul.f32 %v1037_v49, %v1033_v40 }
 0x943   :  { %1038 = vrcp.f32 %v779_v48 }
 0x949   :  { %v1039_v50 = vpop.eup %1038 }
 0x94a   :  { %v783_v52 = vmul.f32 %v1039_v50, %v1035_v43 }
 0x94c   :  { %v784_v53 = vpack.c.bf16 %v783_v52, %v782_v51 }
 0x94e   :  { %972 = vmatmul.msk.bf16.vlgmr.msrb.gmra.mxu1 %vm198_vm3, %v784_v53 }
 0x9cb   :  { %v798_v54 = vpop.f32.mrf.mxu1 }
 0x9d3   :  { %v800_v55 = vpop.f32.mrf.mxu1 }
 0x9d4   :  { %v803_v56 = vpack.c.bf16 %v800_v55, %v798_v54 }
 0x9d6   :  { %974 = vmatmul.msk.bf16.vlgmr.msrb.gmra.mxu2 %vm176_vm2, %v803_v56 }
 0xa59   :  { %v821_v57 = vpop.f32.mrf.mxu2 }
 0xa5a   :  { %v826_v58 = vadd.f32 %v821_v57, %v639_v21 }
 0xa5c   :  { %828 = vst.msk [vmem:[#allocation2] sm:$0xff] %vm97_vm0, %v826_v58 }
 0xa61   :  { %v823_v59 = vpop.f32.mrf.mxu2 }
 0xa62   :  { %v827_v60 = vadd.f32 %v823_v59, %v640_v24 }
 0xa64   :  { %829 = vst.msk [vmem:[#allocation2 + $0x8] sm:$0xff] %vm97_vm0, %v827_v60 }
 0xa65   :  { %842 = dma.vmem_to_hbm [thread:$0]  %s835_s22, 256, %s837_s24, [#allocation3], %s1068_s25, %s1068_s25, %s1069_s26  }
 0xa66   :  { %1064 = dma.done.wait [#allocation3], 256  }
 0xa67   :  { %1065 = vsyncadd [#allocation3], 4294967040 }
 0xa68   :  { %847 = vsyncpa [#allocation3], 1 }

</bundles_post_ra>
